<compile_context>
chip_gen: v5e
topology: v5e:2x2
jax: 0.10.0
libtpu: 0.0.40
codegen_flags: <defaults>
</compile_context>

<pallas_src>
import jax
import jax.numpy as jnp
from jax.experimental import pallas as pl
from jax.experimental.pallas import tpu as pltpu


def attention_pooling_kernel(x_mp_ref, x_ap_ref, w1_ref, b1_ref, w2_ref, b2_ref,
                             out_ref):
    """Fused hot path: one stacked matmul pair + relu + sigmoid + gating."""
    # Load in storage dtype — no full-tile f32 upcast (MXU accumulates in f32).
    x_ap = x_ap_ref[...]
    x_mp = x_mp_ref[...]
    bb = x_ap.shape[0]

    # Fuse both branches: stack along the sublane (batch) axis so there is a
    # single MXU push/drain, one bias broadcast, one ReLU and one sigmoid.
    x = jnp.concatenate([x_ap, x_mp], axis=0)                    # (2*bb, C)

    # Linear(C -> H) + ReLU, f32 accumulation on the MXU.
    h = jnp.dot(x, w1_ref[...], preferred_element_type=jnp.float32) + b1_ref[...]
    h = jnp.maximum(h, 0.0)

    # Linear(H -> C) + exact sigmoid. exp lowers to the EUP slot; the divide
    # is a handful of VPU ops on a bandwidth-bound kernel (negligible).
    logits = jnp.dot(h.astype(w2_ref.dtype), w2_ref[...],
                     preferred_element_type=jnp.float32) + b2_ref[...]
    gate = 1.0 / (1.0 + jnp.exp(-logits))
    gate = gate.astype(x_ap.dtype)                               # gate in I/O dtype

    out = x_ap * gate[:bb] + x_mp * gate[bb:]
    out_ref[...] = out.astype(out_ref.dtype)


def _pick_block_b(B, C, itemsize):
    """Batch tile: sublane-aligned, VMEM-budgeted, >=2 grid steps when possible."""
    sub = 16 if itemsize <= 2 else 8              # sublane packing (bf16 vs f32)
    # (2 inputs + 1 output) x 2 pipeline buffers of (block_b, C); keep well under
    # the 32 MiB default scoped VMEM (also the safe budget on v7x's 64 MiB VMEM).
    budget = 24 * 1024 * 1024
    max_rows = max(sub, budget // (6 * C * itemsize))
    bb = min(B, 1024, max_rows)
    if B >= 2 * sub:
        # At least 2 grid steps so v7x's second TensorCore is not idle.
        bb = min(bb, pl.cdiv(B, 2))
    bb = max(sub, (bb // sub) * sub)              # sublane rule
    return B if bb >= B else bb


def attention_pooling(x_mp, x_ap, w1, b1, w2, b2, *, block_b=None):
    """x_mp, x_ap: (B, C). w1: (C, H), b1: (1, H), w2: (H, C), b2: (1, C)."""
    B, C = x_ap.shape
    H = w1.shape[1]
    itemsize = jnp.dtype(x_ap.dtype).itemsize
    sub = 16 if itemsize <= 2 else 8

    if block_b is None:
        block_b = _pick_block_b(B, C, itemsize)
    else:
        block_b = min(block_b, B)
        if block_b < B:
            # Enforce sublane alignment; a partial last tile is masked on store.
            block_b = max(sub, (block_b // sub) * sub)

    grid = (pl.cdiv(B, block_b),)

    x_spec = pl.BlockSpec((block_b, C), lambda i: (i, 0))
    # Weights/biases use a constant index_map (same tile every step); they are
    # tiny, so default buffering costs negligible VMEM.
    w1_spec = pl.BlockSpec((C, H), lambda i: (0, 0))
    b1_spec = pl.BlockSpec((1, H), lambda i: (0, 0))
    w2_spec = pl.BlockSpec((H, C), lambda i: (0, 0))
    b2_spec = pl.BlockSpec((1, C), lambda i: (0, 0))

    return pl.pallas_call(
        attention_pooling_kernel,
        out_shape=jax.ShapeDtypeStruct((B, C), x_ap.dtype),
        grid_spec=pltpu.PrefetchScalarGridSpec(
            num_scalar_prefetch=0,
            grid=grid,
            in_specs=[x_spec, x_spec, w1_spec, b1_spec, w2_spec, b2_spec],
            out_specs=pl.BlockSpec((block_b, C), lambda i: (i, 0)),
        ),
        compiler_params=pltpu.CompilerParams(
            dimension_semantics=("parallel",)),
    )(x_mp, x_ap, w1, b1, w2, b2)


def reference(x_mp, x_ap, w1, b1, w2, b2):
    """Pure-JAX reference (accurate f32 matmuls)."""
    def gated(x):
        h = jnp.maximum(jnp.dot(x, w1, precision="highest") + b1, 0.0)
        g = jax.nn.sigmoid(jnp.dot(h, w2, precision="highest") + b2)
        return x * g
    return gated(x_ap) + gated(x_mp)


if __name__ == "__main__":
    # Small shapes consistent with the module: in_channel=128, compression_ratio=16.
    C, R = 128, 16
    H = C // R  # 8

    key = jax.random.PRNGKey(0)
    k1, k2, k3, k4, k5, k6 = jax.random.split(key, 6)

    bound1 = 1.0 / (C ** 0.5)
    bound2 = 1.0 / (H ** 0.5)
    w1 = jax.random.uniform(k3, (C, H), minval=-bound1, maxval=bound1, dtype=jnp.float32)
    b1 = jax.random.uniform(k4, (1, H), minval=-bound1, maxval=bound1, dtype=jnp.float32)
    w2 = jax.random.uniform(k5, (H, C), minval=-bound2, maxval=bound2, dtype=jnp.float32)
    b2 = jax.random.uniform(k6, (1, C), minval=-bound2, maxval=bound2, dtype=jnp.float32)

    ok = True
    # (B=8) single-tile case and (B=48) multi-tile case to exercise the grid.
    for B in (8, 48):
        kb1, kb2 = jax.random.split(jax.random.fold_in(key, B))
        x_mp = jax.random.normal(kb1, (B, C), dtype=jnp.float32)
        x_ap = jax.random.normal(kb2, (B, C), dtype=jnp.float32)

        out = attention_pooling(x_mp, x_ap, w1, b1, w2, b2)
        out = jax.block_until_ready(out)

        ref = reference(x_mp, x_ap, w1, b1, w2, b2)
        assert out.shape == (B, C)
        ok &= bool(jnp.allclose(out, ref, atol=2e-3, rtol=2e-3))

    assert ok, "mismatch vs reference"
    print("KERNEL_OK")
</pallas_src>

<mosaic_0001>
module attributes {stable_mosaic.version = 11 : i64} {
  func.func @attention_pooling_kernel(%arg0: i32, %arg1: memref<8x128xf32, #tpu.memory_space<vmem>>, %arg2: memref<8x128xf32, #tpu.memory_space<vmem>>, %arg3: memref<128x8xf32, #tpu.memory_space<vmem>>, %arg4: memref<1x8xf32, #tpu.memory_space<vmem>>, %arg5: memref<8x128xf32, #tpu.memory_space<vmem>>, %arg6: memref<1x128xf32, #tpu.memory_space<vmem>>, %arg7: memref<8x128xf32, #tpu.memory_space<vmem>>) attributes {dimension_semantics = [#tpu.dimension_semantics<parallel>], iteration_bounds = array<i64: 1>, scalar_prefetch = 0 : i64, scratch_operands = 0 : i64, tpu.core_type = #tpu.core_type<tc>, window_params = [{transform_indices = @transform_0, window_bounds = array<i64: 8, 128>}, {transform_indices = @transform_1, window_bounds = array<i64: 8, 128>}, {pipeline_mode = #tpu.pipeline_mode<synchronous>, transform_indices = @transform_2, window_bounds = array<i64: 128, 8>}, {pipeline_mode = #tpu.pipeline_mode<synchronous>, transform_indices = @transform_3, window_bounds = array<i64: 1, 8>}, {pipeline_mode = #tpu.pipeline_mode<synchronous>, transform_indices = @transform_4, window_bounds = array<i64: 8, 128>}, {pipeline_mode = #tpu.pipeline_mode<synchronous>, transform_indices = @transform_5, window_bounds = array<i64: 1, 128>}, {transform_indices = @transform_6, window_bounds = array<i64: 8, 128>}]} {
    %c0 = arith.constant 0 : index
    %c0_0 = arith.constant 0 : index
    %0 = vector.load %arg2[%c0, %c0_0] : memref<8x128xf32, #tpu.memory_space<vmem>>, vector<8x128xf32>
    %c0_1 = arith.constant 0 : index
    %c0_2 = arith.constant 0 : index
    %1 = vector.load %arg1[%c0_1, %c0_2] : memref<8x128xf32, #tpu.memory_space<vmem>>, vector<8x128xf32>
    %2 = tpu.concatenate %0, %1 in 0 : vector<8x128xf32>, vector<8x128xf32> -> vector<16x128xf32>
    %c0_3 = arith.constant 0 : index
    %c0_4 = arith.constant 0 : index
    %3 = vector.load %arg3[%c0_3, %c0_4] : memref<128x8xf32, #tpu.memory_space<vmem>>, vector<128x8xf32>
    %cst = arith.constant dense<0.000000e+00> : vector<16x8xf32>
    %4 = tpu.matmul %2, %3, %cst {dimension_numbers = #tpu.dot_dimension_numbers<[1], [0], [0], [1], [0, 0, 1, 1], [], []>} : vector<16x128xf32>, vector<128x8xf32>, vector<16x8xf32> -> vector<16x8xf32>
    %c0_5 = arith.constant 0 : index
    %c0_6 = arith.constant 0 : index
    %5 = vector.load %arg4[%c0_5, %c0_6] : memref<1x8xf32, #tpu.memory_space<vmem>>, vector<1x8xf32>
    %6 = vector.broadcast %5 : vector<1x8xf32> to vector<16x8xf32>
    %7 = arith.addf %4, %6 : vector<16x8xf32>
    %cst_7 = arith.constant 0.000000e+00 : f32
    %8 = vector.broadcast %cst_7 : f32 to vector<16x8xf32>
    %9 = arith.maximumf %7, %8 : vector<16x8xf32>
    %c0_8 = arith.constant 0 : index
    %c0_9 = arith.constant 0 : index
    %10 = vector.load %arg5[%c0_8, %c0_9] : memref<8x128xf32, #tpu.memory_space<vmem>>, vector<8x128xf32>
    %cst_10 = arith.constant dense<0.000000e+00> : vector<16x128xf32>
    %11 = tpu.matmul %9, %10, %cst_10 {dimension_numbers = #tpu.dot_dimension_numbers<[1], [0], [0], [1], [0, 0, 1, 1], [], []>} : vector<16x8xf32>, vector<8x128xf32>, vector<16x128xf32> -> vector<16x128xf32>
    %c0_11 = arith.constant 0 : index
    %c0_12 = arith.constant 0 : index
    %12 = vector.load %arg6[%c0_11, %c0_12] : memref<1x128xf32, #tpu.memory_space<vmem>>, vector<1x128xf32>
    %13 = vector.broadcast %12 : vector<1x128xf32> to vector<16x128xf32>
    %14 = arith.addf %11, %13 : vector<16x128xf32>
    %cst_13 = arith.constant 0.000000e+00 : f32
    %15 = vector.broadcast %cst_13 : f32 to vector<16x128xf32>
    %16 = arith.subf %15, %14 : vector<16x128xf32>
    %17 = math.exp %16 : vector<16x128xf32>
    %cst_14 = arith.constant 1.000000e+00 : f32
    %18 = vector.broadcast %cst_14 : f32 to vector<16x128xf32>
    %19 = arith.addf %18, %17 : vector<16x128xf32>
    %cst_15 = arith.constant 1.000000e+00 : f32
    %20 = vector.broadcast %cst_15 : f32 to vector<16x128xf32>
    %21 = arith.divf %20, %19 : vector<16x128xf32>
    %22 = vector.extract_strided_slice %21 {offsets = [0, 0], sizes = [8, 128], strides = [1, 1]} : vector<16x128xf32> to vector<8x128xf32>
    %23 = arith.mulf %0, %22 : vector<8x128xf32>
    %24 = vector.extract_strided_slice %21 {offsets = [8, 0], sizes = [8, 128], strides = [1, 1]} : vector<16x128xf32> to vector<8x128xf32>
    %25 = arith.mulf %1, %24 : vector<8x128xf32>
    %26 = arith.addf %23, %25 : vector<8x128xf32>
    %c0_16 = arith.constant 0 : index
    %c0_17 = arith.constant 0 : index
    %27 = vector.load %arg7[%c0_16, %c0_17] : memref<8x128xf32, #tpu.memory_space<vmem>>, vector<8x128xf32>
    tpu.vector_store %arg7[%c0_16, %c0_17], %26 {strides = array<i32>} : memref<8x128xf32, #tpu.memory_space<vmem>>, vector<8x128xf32>,
    return
  }
  func.func @transform_0(%arg0: i32) -> (i32, i32) {
    %c0_i32 = arith.constant 0 : i32
    %c0_i32_0 = arith.constant 0 : i32
    return %arg0, %c0_i32 : i32, i32
  }
  func.func @transform_1(%arg0: i32) -> (i32, i32) {
    %c0_i32 = arith.constant 0 : i32
    %c0_i32_0 = arith.constant 0 : i32
    return %arg0, %c0_i32 : i32, i32
  }
  func.func @transform_2(%arg0: i32) -> (i32, i32) {
    %c0_i32 = arith.constant 0 : i32
    %c0_i32_0 = arith.constant 0 : i32
    %c0_i32_1 = arith.constant 0 : i32
    return %c0_i32, %c0_i32_0 : i32, i32
  }
  func.func @transform_3(%arg0: i32) -> (i32, i32) {
    %c0_i32 = arith.constant 0 : i32
    %c0_i32_0 = arith.constant 0 : i32
    %c0_i32_1 = arith.constant 0 : i32
    return %c0_i32, %c0_i32_0 : i32, i32
  }
  func.func @transform_4(%arg0: i32) -> (i32, i32) {
    %c0_i32 = arith.constant 0 : i32
    %c0_i32_0 = arith.constant 0 : i32
    %c0_i32_1 = arith.constant 0 : i32
    return %c0_i32, %c0_i32_0 : i32, i32
  }
  func.func @transform_5(%arg0: i32) -> (i32, i32) {
    %c0_i32 = arith.constant 0 : i32
    %c0_i32_0 = arith.constant 0 : i32
    %c0_i32_1 = arith.constant 0 : i32
    return %c0_i32, %c0_i32_0 : i32, i32
  }
  func.func @transform_6(%arg0: i32) -> (i32, i32) {
    %c0_i32 = arith.constant 0 : i32
    %c0_i32_0 = arith.constant 0 : i32
    return %arg0, %c0_i32 : i32, i32
  }
}

</mosaic_0001>

<bundles_post_ra>
// kernel: tpu_custom_call.1
= control target key start
LH: loop header
LB: loop body
LE: loop exit
PB: predicated region body
PF: predicated region fallthrough
CT: control target
= control target key end

     0   :  { %s329_s0 = inlined_call_operand.vmem [shape: f32[8,128], index: 0, kind: input, shape index: {}]   ;;  %s330_s1 = inlined_call_operand.vmem [shape: f32[8,128], index: 1, kind: input, shape index: {}]   ;;  %s331_s2 = inlined_call_operand.vmem [shape: f32[128,8], index: 2, kind: input, shape index: {}]   ;;  %s332_s3 = inlined_call_operand.vmem [shape: f32[1,8], index: 3, kind: input, shape index: {}]   ;;  %s333_s4 = inlined_call_operand.vmem [shape: f32[8,128], index: 4, kind: input, shape index: {}]   ;;  %s334_s5 = inlined_call_operand.vmem [shape: f32[1,128], index: 5, kind: input, shape index: {}]   ;;  %s335_s6 = inlined_call_operand.hbm [shape: f32[8,128], index: 6, kind: output, shape index: {}]  }
   0x1   :  { %v41_v0 = vld [vmem:[%s331_s2 + $0x78] sm:$0xff]  ;;  %v40_v1 = vld [vmem:[%s331_s2 + $0x70] sm:$0xff]  ;;  %v39_v2 = vld [vmem:[%s331_s2 + $0x68] sm:$0xff] }
   0x2   :  { %46 = vmatpush.msra.mxu0 %v41_v0  ;;  %166 = vmatpush.msra.mxu2 %v41_v0  ;;  %v38_v3 = vld [vmem:[%s331_s2 + $0x60] sm:$0xff]  ;;  %v37_v4 = vld [vmem:[%s331_s2 + $0x58] sm:$0xff] }
   0x4   :  { %47 = vmatpush.msra.mxu0 %v40_v1  ;;  %167 = vmatpush.msra.mxu2 %v40_v1 }
   0x6   :  { %48 = vmatpush.msra.mxu0 %v39_v2  ;;  %168 = vmatpush.msra.mxu2 %v39_v2 }
   0x8   :  { %49 = vmatpush.msra.mxu0 %v38_v3  ;;  %169 = vmatpush.msra.mxu2 %v38_v3 }
   0x9   :  { %11 = vsyncpa [#allocation3], 0  ;;  %v36_v5 = vld [vmem:[%s331_s2 + $0x50] sm:$0xff]  ;;  %v35_v6 = vld [vmem:[%s331_s2 + $0x48] sm:$0xff]  ;;  %vm76_vm0 = vcmask 64512   ;;  %s155_s13 = sshll.u32 %s335_s6, 4  ;;  %s156_s13 = int_to_ptr.hbm [resolvable:$true] %s155_s13 }
   0xa   :  { %50 = vmatpush.msra.mxu0 %v37_v4  ;;  %170 = vmatpush.msra.mxu2 %v37_v4  ;;  %v34_v7 = vld [vmem:[%s331_s2 + $0x40] sm:$0xff]  ;;  %v33_v8 = vld [vmem:[%s331_s2 + $0x38] sm:$0xff]  ;;  %v32_v9 = vld [vmem:[%s331_s2 + $0x30] sm:$0xff] }
   0xb   :  { %v31_v10 = vld [vmem:[%s331_s2 + $0x28] sm:$0xff]  ;;  %v30_v11 = vld [vmem:[%s331_s2 + $0x20] sm:$0xff]  ;;  %v29_v12 = vld [vmem:[%s331_s2 + $0x18] sm:$0xff] }
   0xc   :  { %51 = vmatpush.msra.mxu0 %v36_v5  ;;  %171 = vmatpush.msra.mxu2 %v36_v5  ;;  %v28_v13 = vld [vmem:[%s331_s2 + $0x10] sm:$0xff]  ;;  %v27_v14 = vld [vmem:[%s331_s2 + $0x8] sm:$0xff]  ;;  %v26_v15 = vld [vmem:[%s331_s2] sm:$0xff] }
   0xd   :  { %v306_v16 = vld [vmem:[%s330_s1] sm:$0xff] }
   0xe   :  { %52 = vmatpush.msra.mxu0 %v35_v6  ;;  %172 = vmatpush.msra.mxu2 %v35_v6  ;;  %v311_v17 = vld [vmem:[%s329_s0] sm:$0xff] }
   0xf   :  { %v71_v18 = vld [vmem:[%s333_s4] sm:$0xff] }
  0x10   :  { %53 = vmatpush.msra.mxu0 %v34_v7  ;;  %173 = vmatpush.msra.mxu2 %v34_v7  ;;  %v183_v19 = vld [vmem:[%s332_s3] ss:$0 sm:$0xff]  ;;  %s219_s3 = smov [#allocation2]  }
  0x11   :  { %98 = vmatpush.msra.mxu1 %v71_v18  ;;  %v184_v26 = vld [vmem:[%s334_s5] ss:$0 sm:$0xff]  ;;  %s153_s4 = sshll.u32 %s219_s3, 4  ;;  %s154_s4 = int_to_ptr.vmem [resolvable:$true] %s153_s4 }
  0x12   :  { %54 = vmatpush.msra.mxu0 %v33_v8  ;;  %174 = vmatpush.msra.mxu2 %v33_v8 }
  0x14   :  { %55 = vmatpush.msra.mxu0 %v32_v9  ;;  %175 = vmatpush.msra.mxu2 %v32_v9 }
  0x16   :  { %56 = vmatpush.msra.mxu0 %v31_v10  ;;  %176 = vmatpush.msra.mxu2 %v31_v10 }
  0x18   :  { %57 = vmatpush.msra.mxu0 %v30_v11  ;;  %177 = vmatpush.msra.mxu2 %v30_v11 }
  0x1a   :  { %58 = vmatpush.msra.mxu0 %v29_v12  ;;  %178 = vmatpush.msra.mxu2 %v29_v12 }
  0x1c   :  { %59 = vmatpush.msra.mxu0 %v28_v13  ;;  %179 = vmatpush.msra.mxu2 %v28_v13 }
  0x1e   :  { %60 = vmatpush.msra.mxu0 %v27_v14  ;;  %180 = vmatpush.msra.mxu2 %v27_v14 }
  0x20   :  { %61 = vmatpush.msra.mxu0 %v26_v15  ;;  %181 = vmatpush.msra.mxu2 %v26_v15 }
  0x21   :  { %62 = vmatmul.f32.vlgmr.msra.gmra.mxu0 %v306_v16  ;;  %65 = vmatmul.f32.vlgmr.msra.gmra.mxu2 %v311_v17 }
  0x9e   :  { %v63_v20 = vpop.f32.mrf.mxu0 }
  0x9f   :  { %v64_v21 = vadd.f32 %v183_v19, %v63_v20 }
  0xa1   :  { %v69_v22 = vmax.f32 %v64_v21, 0.0 }
  0xa3   :  { %164 = vmatmul.msk.f32.vlgmr.msra.gmra.mxu1 %vm76_vm0, %v69_v22 }
  0xa4   :  { %v66_v23 = vpop.f32.mrf.mxu2 }
  0xa5   :  { %v67_v24 = vadd.f32 %v183_v19, %v66_v23 }
  0xa7   :  { %v70_v25 = vmax.f32 %v67_v24, 0.0 }
  0xab   :  { %165 = vmatmul.msk.f32.gmra.mxu1 %vm76_vm0, %v70_v25 }
 0x120   :  { %v100_v27 = vpop.f32.mrf.mxu1 }
 0x121   :  { %v101_v28 = vadd.f32 %v184_v26, %v100_v27 }
 0x123   :  { %v106_v29 = vsub.f32 0.0, %v101_v28 }
 0x125   :  { %v108_v30 = vmul.f32 1.442695, %v106_v29 }
 0x127   :  { %185 = vpow2.f32 %v108_v30 }
 0x128   :  { %v103_v31 = vpop.f32.mrf.mxu1 }
 0x129   :  { %v104_v32 = vadd.f32 %v184_v26, %v103_v31 }
 0x12b   :  { %v107_v33 = vsub.f32 0.0, %v104_v32 }
 0x12d   :  { %v186_v34 = vpop.eup %185  ;;  %v110_v35 = vmul.f32 1.442695, %v107_v33 }
 0x12e   :  { %v112_v36 = vadd.f32 1.0, %v186_v34 }
 0x12f   :  { %187 = vpow2.f32 %v110_v35 }
 0x130   :  { %189 = vrcp.f32 %v112_v36  ;;  %v125_v46 = vand.u32 2147483648, %v112_v36  ;;  %vm119_vm2 = vweird.f32 %v112_v36  ;;  %v123_v48 = vand.u32 2147483647, %v112_v36 }
 0x132   :  { %v126_v53 = vor.u32 1.1754944e-38, %v125_v46  ;;  %vm124_vm5 = vcmp.eq.f32.partialorder %v123_v48, 8.507059e+37 }
 0x135   :  { %v188_v37 = vpop.eup %187 }
 0x136   :  { %v190_v38 = vpop.eup %189  ;;  %v113_v39 = vadd.f32 1.0, %v188_v37 }
 0x137   :  { %v115_v40 = vmul.f32 %v190_v38, %v112_v36  ;;  %vm120_vm1 = vweird.f32 %v190_v38 }
 0x138   :  { %191 = vrcp.f32 %v113_v39  ;;  %vm121_vm3 = vmor %vm119_vm2, %vm120_vm1  ;;  %v140_v49 = vand.u32 2147483648, %v113_v39  ;;  %v138_v52 = vand.u32 2147483647, %v113_v39  ;;  %vm134_vm6 = vweird.f32 %v113_v39 }
 0x139   :  { %v116_v41 = vsub.f32 1.0, %v115_v40 }
 0x13a   :  { %v141_v56 = vor.u32 1.1754944e-38, %v140_v49  ;;  %vm139_vm8 = vcmp.eq.f32.partialorder %v138_v52, 8.507059e+37 }
 0x13b   :  { %v117_v42 = vmul.f32 %v190_v38, %v116_v41 }
 0x13d   :  { %v118_v45 = vadd.f32 %v190_v38, %v117_v42 }
 0x13e   :  { %v192_v43 = vpop.eup %191 }
 0x13f   :  { %v130_v44 = vmul.f32 %v192_v43, %v113_v39  ;;  %v122_v50 = vsel %vm121_vm3, %v190_v38, %v118_v45  ;;  %vm135_vm4 = vweird.f32 %v192_v43 }
 0x140   :  { %v127_v55 = vsel %vm124_vm5, %v126_v53, %v122_v50  ;;  %vm136_vm7 = vmor %vm134_vm6, %vm135_vm4 }
 0x141   :  { %v131_v47 = vsub.f32 1.0, %v130_v44  ;;  %v144_v59 = vmul.f32 %v127_v55, %v306_v16 }
 0x143   :  { %v132_v51 = vmul.f32 %v192_v43, %v131_v47 }
 0x145   :  { %v133_v54 = vadd.f32 %v192_v43, %v132_v51 }
 0x147   :  { %v137_v57 = vsel %vm136_vm7, %v192_v43, %v133_v54 }
 0x148   :  { %v142_v58 = vsel %vm139_vm8, %v141_v56, %v137_v57 }
 0x149   :  { %v145_v60 = vmul.f32 %v142_v58, %v311_v17 }
 0x14b   :  { %v146_v61 = vadd.f32 %v145_v60, %v144_v59 }
 0x14d   :  { %147 = vst [vmem:[#allocation2] sm:$0xff] %v146_v61 }
 0x14e   :  { %158 = dma.vmem_to_hbm [thread:$0]  %s154_s4, 128, %s156_s13, [#allocation3]  }
 0x14f   :  { %217 = dma.done.wait [#allocation3], 128  }
 0x150   :  { %218 = vsyncadd [#allocation3], 4294967168 }
 0x151   :  { %163 = vsyncpa [#allocation3], 1 }

</bundles_post_ra>
